<compile_context>
chip_gen: v6e
topology: v6e:2x2x1
jax: 0.10.0
libtpu: 0.0.40
codegen_flags: <defaults>
</compile_context>

<pallas_src>
import numpy as np

import jax
import jax.numpy as jnp
from jax.experimental import pallas as pl
from jax.experimental.pallas import tpu as pltpu


def get_laplacian_kernel2d(kernel_size: int) -> jnp.ndarray:
    """Deterministic Laplacian kernel, identical to kornia's get_laplacian_kernel2d."""
    kernel = jnp.ones((kernel_size, kernel_size), dtype=jnp.float32)
    mid = kernel_size // 2
    kernel = kernel.at[mid, mid].set(1.0 - float(kernel_size ** 2))
    return kernel


_SUPPORTED_BORDERS = ("constant", "reflect", "replicate", "circular")


def _cdiv(a: int, b: int) -> int:
    return -(-a // b)


def _border_box_matrix(size: int, k: int, mode: str) -> np.ndarray:
    """(size, size) matrix M with M[src, dst] = number of taps of the length-k
    all-ones filter centred at dst that read source index src after applying
    `mode` padding:  box(x)[dst] = sum_src x[src] * M[src, dst]."""
    p = k // 2
    M = np.zeros((size, size), dtype=np.float32)
    for dst in range(size):
        for j in range(k):
            q = dst - p + j
            if 0 <= q < size:
                src = q
            else:
                if mode == "constant":
                    continue  # zero padding contributes nothing
                if q < 0:
                    d = -q
                    src = {"reflect": d, "replicate": 0, "circular": size - d}[mode]
                else:
                    d = q - size + 1
                    src = {"reflect": size - 1 - d, "replicate": size - 1,
                           "circular": d - 1}[mode]
            M[src, dst] += 1.0
    return M


def _make_kernel(Ct: int, ksq: float):
    prec = jax.lax.Precision.HIGHEST

    def compute_one(c, mht, mw, x_ref, o_ref):
        xc = x_ref[c].astype(jnp.float32)                    # (H, PW)
        hs = jnp.dot(xc, mw, preferred_element_type=jnp.float32, precision=prec)
        box = jnp.dot(mht, hs, preferred_element_type=jnp.float32, precision=prec)
        # box2d counts the centre tap with weight 1; true centre weight is 1-k^2.
        o_ref[c] = (box - ksq * xc).astype(o_ref.dtype)

    def kernel_fn(mht_ref, mw_ref, x_ref, o_ref):
        mht = mht_ref[...]                                   # (H, H)  f32
        mw = mw_ref[...]                                     # (PW, PW) f32
        if Ct <= 8:
            for c in range(Ct):                              # short, unrolled
                compute_one(c, mht, mw, x_ref, o_ref)
        else:
            def body(c, carry):
                compute_one(c, mht, mw, x_ref, o_ref)
                return carry
            jax.lax.fori_loop(0, Ct, body, 0)

    return kernel_fn


def laplacian(x: jnp.ndarray, kernel_size: int, border_type: str = "reflect") -> jnp.ndarray:
    """Pallas implementation of kornia.filters.Laplacian(kernel_size, border_type)(x)."""
    B, C, H, W = x.shape
    k = int(kernel_size)
    p = k // 2
    if border_type not in _SUPPORTED_BORDERS:
        raise ValueError(f"unsupported border_type: {border_type}")
    if border_type == "reflect" and (p >= H or p >= W):
        raise ValueError("reflect padding requires kernel_size//2 < H and < W")
    if border_type == "circular" and (p > H or p > W):
        raise ValueError("circular padding requires kernel_size//2 <= H and <= W")

    BC = B * C
    x2 = x.reshape(BC, H, W)

    # ---- lane-dense packing: G images side by side on the 128-lane axis --------
    if W < 128:
        gmax = max(1, 128 // W)
        G = 1
        for g in range(min(gmax, BC), 0, -1):
            if BC % g == 0:
                G = g
                break
    else:
        G = 1
    N = BC // G
    PW = G * W
    if G > 1:
        xp = jnp.transpose(x2.reshape(N, G, H, W), (0, 2, 1, 3)).reshape(N, H, PW)
    else:
        xp = x2

    # ---- border-aware all-ones box matrices (Laplacian = box2d - k^2 * x) ------
    mw1 = _border_box_matrix(W, k, border_type)              # (W, W)
    mw_np = np.zeros((PW, PW), dtype=np.float32)             # block-diag over packed images
    for g in range(G):
        mw_np[g * W:(g + 1) * W, g * W:(g + 1) * W] = mw1
    mht_np = np.ascontiguousarray(_border_box_matrix(H, k, border_type).T)  # (H, H)
    mw = jnp.asarray(mw_np)
    mht = jnp.asarray(mht_np)

    # ---- generation-aware block sizing ------------------------------------------
    try:
        vmem_phys = int(pltpu.get_tpu_info().vmem_capacity_bytes)
    except Exception:
        vmem_phys = 64 * 1024 * 1024          # conservative (v7x per-core VMEM)
    budget = int(vmem_phys * 0.55)            # headroom for compiler scratch
    esize = x.dtype.itemsize
    per_c = H * PW * esize                    # one packed image slab in the block
    fixed = 2 * (PW * PW * 4 + H * H * 4) + 8 * H * PW * 4   # matrices + f32 temps
    ct_cap = max(1, (budget - fixed) // (4 * per_c))         # 2x dbuf in + 2x dbuf out
    target_steps = 6                          # >= 2 TCs x ~3-deep pipeline on v7x
    Ct = int(max(1, min(ct_cap, N, _cdiv(N, target_steps))))
    num_steps = _cdiv(N, Ct)                  # trailing partial block is masked by Pallas

    kernel_fn = _make_kernel(Ct, float(k * k))

    outp = pl.pallas_call(
        kernel_fn,
        out_shape=jax.ShapeDtypeStruct((N, H, PW), x.dtype),
        grid=(num_steps,),
        in_specs=[
            pl.BlockSpec((H, H), lambda n: (0, 0)),          # MhT  (full array)
            pl.BlockSpec((PW, PW), lambda n: (0, 0)),        # Mw   (full array)
            pl.BlockSpec((Ct, H, PW), lambda n: (n, 0, 0)),  # packed input
        ],
        out_specs=pl.BlockSpec((Ct, H, PW), lambda n: (n, 0, 0)),
        compiler_params=pltpu.CompilerParams(
            dimension_semantics=("parallel",),
            vmem_limit_bytes=int(vmem_phys * 0.75),
        ),
    )(mht, mw, xp)

    if G > 1:
        out = jnp.transpose(outp.reshape(N, H, G, W), (0, 2, 1, 3)).reshape(B, C, H, W)
    else:
        out = outp.reshape(B, C, H, W)
    return out


def _reference(x: jnp.ndarray, kernel_size: int, border_type: str = "reflect") -> jnp.ndarray:
    """Pure-JAX reference (depthwise correlation) for correctness checks."""
    B, C, H, W = x.shape
    k = kernel_size
    p = k // 2
    mode = {"constant": "constant", "reflect": "reflect",
            "replicate": "edge", "circular": "wrap"}[border_type]
    x_pad = jnp.pad(x, ((0, 0), (0, 0), (p, p), (p, p)), mode=mode)
    lap = get_laplacian_kernel2d(k)
    acc = jnp.zeros((B, C, H, W), dtype=jnp.float32)
    for i in range(k):
        for j in range(k):
            acc = acc + lap[i, j] * x_pad[:, :, i:i + H, j:j + W].astype(jnp.float32)
    return acc.astype(x.dtype)


def _check(x, k, border):
    out = jax.block_until_ready(laplacian(x, k, border_type=border))
    ref = _reference(x, k, border_type=border)
    assert out.shape == x.shape and out.dtype == x.dtype
    assert jnp.allclose(out, ref, atol=2e-4, rtol=2e-4), (
        f"mismatch for k={k}, border={border}, shape={x.shape}")


if __name__ == "__main__":
    key = jax.random.PRNGKey(0)

    # Primary test: module-consistent shapes.
    x = jax.random.uniform(key, (2, 4, 16, 16), dtype=jnp.float32)
    _check(x, 5, "reflect")

    # Docstring-example shape (2, 4, 5, 5).
    x_doc = jax.random.uniform(jax.random.PRNGKey(2), (2, 4, 5, 5), dtype=jnp.float32)
    _check(x_doc, 5, "reflect")

    # Odd, non-aligned spatial dims + replicate border.
    x_odd = jax.random.normal(jax.random.PRNGKey(1), (1, 3, 13, 17), dtype=jnp.float32)
    _check(x_odd, 3, "replicate")

    # Constant (zero) border, k = 7.
    x_c = jax.random.normal(jax.random.PRNGKey(3), (1, 2, 16, 16), dtype=jnp.float32)
    _check(x_c, 7, "constant")

    # Circular border, k = 3.
    _check(x, 3, "circular")

    print("KERNEL_OK")
</pallas_src>

<mosaic_0001>
module attributes {stable_mosaic.version = 11 : i64} {
  func.func @kernel_fn(%arg0: i32, %arg1: memref<16x16xf32, #tpu.memory_space<vmem>>, %arg2: memref<128x128xf32, #tpu.memory_space<vmem>>, %arg3: memref<1x16x128xf32, #tpu.memory_space<vmem>>, %arg4: memref<1x16x128xf32, #tpu.memory_space<vmem>>) attributes {dimension_semantics = [#tpu.dimension_semantics<parallel>], iteration_bounds = array<i64: 1>, scalar_prefetch = 0 : i64, scratch_operands = 0 : i64, tpu.core_type = #tpu.core_type<tc>, window_params = [{pipeline_mode = #tpu.pipeline_mode<synchronous>, transform_indices = @transform_0, window_bounds = array<i64: 16, 16>}, {pipeline_mode = #tpu.pipeline_mode<synchronous>, transform_indices = @transform_1, window_bounds = array<i64: 128, 128>}, {transform_indices = @transform_2, window_bounds = array<i64: 1, 16, 128>}, {transform_indices = @transform_3, window_bounds = array<i64: 1, 16, 128>}]} {
    %c0 = arith.constant 0 : index
    %c0_0 = arith.constant 0 : index
    %0 = vector.load %arg1[%c0, %c0_0] : memref<16x16xf32, #tpu.memory_space<vmem>>, vector<16x16xf32>
    %c0_1 = arith.constant 0 : index
    %c0_2 = arith.constant 0 : index
    %1 = vector.load %arg2[%c0_1, %c0_2] : memref<128x128xf32, #tpu.memory_space<vmem>>, vector<128x128xf32>
    %c0_3 = arith.constant 0 : index
    %c0_4 = arith.constant 0 : index
    %c0_5 = arith.constant 0 : index
    %2 = vector.load %arg3[%c0_3, %c0_4, %c0_5] : memref<1x16x128xf32, #tpu.memory_space<vmem>>, vector<1x16x128xf32>
    %3 = vector.shape_cast %2 : vector<1x16x128xf32> to vector<16x128xf32>
    %cst = arith.constant dense<0.000000e+00> : vector<16x128xf32>
    %4 = tpu.matmul %3, %1, %cst {dimension_numbers = #tpu.dot_dimension_numbers<[1], [0], [0], [1], [0, 0, 1, 1], [], []>, precision = #tpu.contract_precision<fp32>} : vector<16x128xf32>, vector<128x128xf32>, vector<16x128xf32> -> vector<16x128xf32>
    %cst_6 = arith.constant dense<0.000000e+00> : vector<16x128xf32>
    %5 = tpu.matmul %0, %4, %cst_6 {dimension_numbers = #tpu.dot_dimension_numbers<[1], [0], [0], [1], [0, 0, 1, 1], [], []>, precision = #tpu.contract_precision<fp32>} : vector<16x16xf32>, vector<16x128xf32>, vector<16x128xf32> -> vector<16x128xf32>
    %cst_7 = arith.constant 2.500000e+01 : f32
    %6 = vector.broadcast %cst_7 : f32 to vector<16x128xf32>
    %7 = arith.mulf %6, %3 : vector<16x128xf32>
    %8 = arith.subf %5, %7 : vector<16x128xf32>
    %c0_8 = arith.constant 0 : index
    %c0_9 = arith.constant 0 : index
    %c0_10 = arith.constant 0 : index
    %9 = vector.load %arg4[%c0_8, %c0_9, %c0_10] : memref<1x16x128xf32, #tpu.memory_space<vmem>>, vector<1x16x128xf32>
    %10 = vector.shape_cast %9 : vector<1x16x128xf32> to vector<16x128xf32>
    %11 = vector.shape_cast %8 : vector<16x128xf32> to vector<1x16x128xf32>
    tpu.vector_store %arg4[%c0_8, %c0_9, %c0_10], %11 {strides = array<i32>} : memref<1x16x128xf32, #tpu.memory_space<vmem>>, vector<1x16x128xf32>,
    return
  }
  func.func @transform_0(%arg0: i32) -> (i32, i32) {
    %c0_i32 = arith.constant 0 : i32
    %c0_i32_0 = arith.constant 0 : i32
    %c0_i32_1 = arith.constant 0 : i32
    return %c0_i32, %c0_i32_0 : i32, i32
  }
  func.func @transform_1(%arg0: i32) -> (i32, i32) {
    %c0_i32 = arith.constant 0 : i32
    %c0_i32_0 = arith.constant 0 : i32
    %c0_i32_1 = arith.constant 0 : i32
    return %c0_i32, %c0_i32_0 : i32, i32
  }
  func.func @transform_2(%arg0: i32) -> (i32, i32, i32) {
    %c0_i32 = arith.constant 0 : i32
    %c0_i32_0 = arith.constant 0 : i32
    %c0_i32_1 = arith.constant 0 : i32
    return %arg0, %c0_i32, %c0_i32_0 : i32, i32, i32
  }
  func.func @transform_3(%arg0: i32) -> (i32, i32, i32) {
    %c0_i32 = arith.constant 0 : i32
    %c0_i32_0 = arith.constant 0 : i32
    %c0_i32_1 = arith.constant 0 : i32
    return %arg0, %c0_i32, %c0_i32_0 : i32, i32, i32
  }
}

</mosaic_0001>

<bundles_post_ra>
// kernel: tpu_custom_call.1
= control target key start
LH: loop header
LB: loop body
LE: loop exit
PB: predicated region body
PF: predicated region fallthrough
CT: control target
= control target key end

     0   :  { %8 = vsyncpa [#allocation3], 0  ;;  %s2200_s0 = inlined_call_operand.hbm [shape: f32[16,16], index: 0, kind: input, shape index: {}]   ;;  %s2201_s1 = inlined_call_operand.hbm [shape: f32[128,128], index: 1, kind: input, shape index: {}]   ;;  %s2202_s2 = inlined_call_operand.hbm [shape: f32[1,16,128], index: 2, kind: input, shape index: {}]   ;;  %s2203_s3 = inlined_call_operand.hbm [shape: f32[1,16,128], index: 3, kind: output, shape index: {}]  }
   0x1   :  { %9 = vsyncpa [#allocation6], 0 }
   0x2   :  { %10 = vsyncpa [#allocation4], 0  ;;  %s1769_s12 = smov [#allocation5]   ;;  %s1770_s14 = smov [#allocation2]  }
   0x3   :  { %s28_s13 = sshll.u32 %s1769_s12, 4  ;;  %s16_s15 = sshll.u32 %s1770_s14, 4  ;;  %s29_s13 = int_to_ptr.vmem [resolvable:$true] %s28_s13  ;;  %s17_s15 = int_to_ptr.vmem [resolvable:$true] %s16_s15 }
   0x4   :  { %s1691_s16 = scalar_lea.vmem %s29_s13, 2048  ;;  %p1696_p1 = scmp.lt.s32.totalorder %s29_s13, %s29_s13 }
   0x5   :  { %p1692_p0 = scmp.ne.s32.totalorder %s29_s13, %s1691_s16  ;;  %p1697_p2 = scmp.lt.s32.totalorder %s1691_s16, %s1691_s16 }
   0x7   :  { %p1698_p3 = por %p1697_p2, %p1696_p1 }
   0x9   :  { %p1699_p4 = pnand %p1698_p3, %p1692_p0 }
   0xb   :  { %1702 = shalt.err (!%p1699_p4)
}
   0xc   :  { %s1771_s17 = smov 128   ;;  %s1772_s18 = smov 8  }
   0xd   :  { %34 = dma.hbm_to_vmem [thread:$0]  %s2201_s1, 2048, %s29_s13, [#allocation6], %s1771_s17, %s1771_s17, %s1772_s18  }
   0xe   :  { %s1711_s21 = scalar_lea.vmem %s17_s15, 256  ;;  %p1716_p6 = scmp.lt.s32.totalorder %s17_s15, %s17_s15 }
   0xf   :  { %p1712_p5 = scmp.ne.s32.totalorder %s17_s15, %s1711_s21  ;;  %p1717_p7 = scmp.lt.s32.totalorder %s1711_s21, %s1711_s21 }
  0x11   :  { %p1718_p8 = por %p1717_p7, %p1716_p6 }
  0x13   :  { %p1719_p9 = pnand %p1718_p8, %p1712_p5 }
  0x15   :  { %1722 = shalt.err (!%p1719_p9)
}
  0x16   :  { %22 = dma.hbm_to_vmem [thread:$0]  %s2200_s0, 256, %s17_s15, [#allocation3], %s1771_s17, %s1771_s17, %s1772_s18  }
  0x17   :  { %s1773_s24 = smov [#allocation7]  }
  0x18   :  { %s40_s25 = sshll.u32 %s1773_s24, 4  ;;  %s41_s25 = int_to_ptr.vmem [resolvable:$true] %s40_s25 }
  0x19   :  { %s1731_s26 = scalar_lea.vmem %s41_s25, 256  ;;  %p1736_p11 = scmp.lt.s32.totalorder %s41_s25, %s41_s25 }
  0x1a   :  { %p1732_p10 = scmp.ne.s32.totalorder %s41_s25, %s1731_s26  ;;  %p1737_p12 = scmp.lt.s32.totalorder %s1731_s26, %s1731_s26 }
  0x1c   :  { %p1738_p13 = por %p1737_p12, %p1736_p11 }
  0x1e   :  { %p1739_p0 = pnand %p1738_p13, %p1732_p10 }
  0x20   :  { %1742 = shalt.err (!%p1739_p0)
}
  0x21   :  { %46 = dma.hbm_to_vmem [thread:$0]  %s2202_s2, 256, %s41_s25, [#allocation6], %s1771_s17, %s1771_s17, %s1772_s18  }
  0x22   :  { %1763 = dma.done.wait [#allocation3], 256  }
  0x23   :  { %1764 = vsyncadd [#allocation3], 4294967040 }
  0x24   :  { %1765 = dma.done.wait [#allocation6], 2304  }
  0x25   :  { %1766 = vsyncadd [#allocation6], 4294964992  ;;  %v73_v0 = vld [vmem:[#allocation5 + $0x78] sm:$0xff]  ;;  %v72_v1 = vld [vmem:[#allocation5 + $0x70] sm:$0xff]  ;;  %vm760_vm0 = vcmask 130048   ;;  %s1774_s0 = smov [#allocation8]  }
  0x26   :  { %v71_v2 = vld [vmem:[#allocation5 + $0x68] sm:$0xff]  ;;  %v1813_v3 = vand.u32 4294901760, %v73_v0  ;;  %v1815_v4 = vand.u32 4294901760, %v72_v1  ;;  %v70_v6 = vld [vmem:[#allocation5 + $0x60] sm:$0xff]  ;;  %v69_v7 = vld [vmem:[#allocation5 + $0x58] sm:$0xff]  ;;  %s1280_s2 = sshll.u32 %s1774_s0, 4  ;;  %s1281_s2 = int_to_ptr.vmem [resolvable:$true] %s1280_s2 }
  0x27   :  { %v1817_v5 = vand.u32 4294901760, %v71_v2  ;;  %v68_v8 = vld [vmem:[#allocation5 + $0x50] sm:$0xff]  ;;  %v1819_v9 = vand.u32 4294901760, %v70_v6  ;;  %v1821_v10 = vand.u32 4294901760, %v69_v7  ;;  %v67_v12 = vld [vmem:[#allocation5 + $0x48] sm:$0xff]  ;;  %v66_v13 = vld [vmem:[#allocation5 + $0x40] sm:$0xff]  ;;  %p1748_p2 = scmp.lt.s32.totalorder %s1281_s2, %s1281_s2 }
  0x28   :  { %v1823_v11 = vand.u32 4294901760, %v68_v8  ;;  %1425 = vmatprep.subr.mxu0 %v1813_v3  ;;  %v1827_v14 = vsub.f32 %v73_v0, %v1813_v3  ;;  %v1830_v15 = vsub.f32 %v72_v1, %v1815_v4  ;;  %v1832_v16 = vand.u32 4294901760, %v67_v12  ;;  %v65_v18 = vld [vmem:[#allocation5 + $0x38] sm:$0xff]  ;;  %v64_v25 = vld [vmem:[#allocation5 + $0x30] sm:$0xff]  ;;  %v63_v35 = vld [vmem:[#allocation5 + $0x28] sm:$0xff]  ;;  %s1743_s28 = scalar_lea.vmem %s1281_s2, 256 }
  0x29   :  { %v1835_v17 = vsub.f32 %v71_v2, %v1817_v5  ;;  %1426 = vmatpush3.msra.mxu0 %v1813_v3  ;;  %v1839_v19 = vsub.f32 %v70_v6, %v1819_v9  ;;  %v1842_v20 = vsub.f32 %v69_v7, %v1821_v10  ;;  %v1854_v24 = vand.u32 4294901760, %v66_v13  ;;  %v62_v40 = vld [vmem:[#allocation5 + $0x20] sm:$0xff]  ;;  %v61_v48 = vld [vmem:[#allocation5 + $0x18] sm:$0xff]  ;;  %v1916_v54 = vld [vmem:[#allocation7 + $0x8] sm:$0xff]  ;;  %p1744_p1 = scmp.ne.s32.totalorder %s1281_s2, %s1743_s28  ;;  %p1749_p3 = scmp.lt.s32.totalorder %s1743_s28, %s1743_s28 }
  0x2a   :  { %1427 = vmatprep.subr.mxu0 %v1815_v4  ;;  %v1846_v21 = vand.u32 4294901760, %v1827_v14  ;;  %v1849_v22 = vand.u32 4294901760, %v1830_v15  ;;  %v1860_v27 = vand.u32 4294901760, %v65_v18  ;;  %v1866_v29 = vsub.f32 %v68_v8, %v1823_v11  ;;  %v1905_v49 = vld [vmem:[#allocation7] sm:$0xff]  ;;  %2209 = vst [vmem:[#allocation13_spill] sm:$0xff] %v1916_v54  ;;  %v60_v59 = vld [vmem:[#allocation5 + $0x10] sm:$0xff] }
  0x2b   :  { %v1852_v23 = vand.u32 4294901760, %v1835_v17  ;;  %1428 = vmatpush3.msra.mxu0 %v1815_v4  ;;  %v1858_v26 = vand.u32 4294901760, %v1839_v19  ;;  %v1863_v28 = vand.u32 4294901760, %v1842_v20  ;;  %v1876_v33 = vsub.f32 %v67_v12, %v1832_v16  ;;  %2208 = vst [vmem:[#allocation12_spill] sm:$0xff] %v1905_v49  ;;  %v59_v2 = vld [vmem:[#allocation5 + $0x8] sm:$0xff]  ;;  %p1750_p4 = por %p1749_p3, %p1748_p2 }
  0x2c   :  { %1429 = vmatprep.subr.mxu0 %v1817_v5  ;;  %v181_v30 = vsub.f32 %v1827_v14, %v1846_v21  ;;  %v188_v31 = vsub.f32 %v1830_v15, %v1849_v22  ;;  %v1879_v34 = vand.u32 4294901760, %v64_v25  ;;  %v1885_v39 = vand.u32 4294901760, %v1866_v29 }
  0x2d   :  { %v195_v32 = vsub.f32 %v1835_v17, %v1852_v23  ;;  %1430 = vmatpush3.msra.mxu0 %v1817_v5  ;;  %v202_v38 = vsub.f32 %v1839_v19, %v1858_v26  ;;  %v209_v41 = vsub.f32 %v1842_v20, %v1863_v28  ;;  %v1891_v42 = vand.u32 4294901760, %v1876_v33  ;;  %p1751_p5 = pnand %p1750_p4, %p1744_p1 }
  0x2e   :  { %1431 = vmatprep.subr.mxu0 %v1819_v9  ;;  %v182_v36 = vand.u32 4294901760, %v181_v30  ;;  %v189_v37 = vand.u32 4294901760, %v188_v31  ;;  %v1894_v43 = vsub.f32 %v66_v13, %v1854_v24  ;;  %v1897_v45 = vand.u32 4294901760, %v63_v35 }
  0x2f   :  { %1432 = vmatpush3.msra.mxu0 %v1819_v9  ;;  %v196_v44 = vand.u32 4294901760, %v195_v32  ;;  %v1900_v46 = vsub.f32 %v65_v18, %v1860_v27  ;;  %v1903_v47 = vand.u32 4294901760, %v62_v40  ;;  %v203_v50 = vand.u32 4294901760, %v202_v38  ;;  %v58_v18 = vld [vmem:[#allocation5] sm:$0xff] }
  0x30   :  { %1433 = vmatprep.subr.mxu0 %v1821_v10  ;;  %1460 = vmatprep.subr.mxu1 %v182_v36  ;;  %v216_v51 = vsub.f32 %v1866_v29, %v1885_v39  ;;  %v1911_v52 = vand.u32 4294901760, %v1894_v43  ;;  %v1914_v53 = vsub.f32 %v64_v25, %v1879_v34  ;;  %v210_v55 = vand.u32 4294901760, %v209_v41 }
  0x31   :  { %1434 = vmatpush3.msra.mxu0 %v1821_v10  ;;  %1461 = vmatpush3.msra.mxu1 %v182_v36  ;;  %v223_v56 = vsub.f32 %v1876_v33, %v1891_v42  ;;  %v1922_v57 = vand.u32 4294901760, %v61_v48  ;;  %v1925_v58 = vand.u32 4294901760, %v1900_v46  ;;  %v1928_v60 = vsub.f32 %v63_v35, %v1897_v45 }
  0x32   :  { %1435 = vmatprep.subr.mxu0 %v1823_v11  ;;  %1462 = vmatprep.subr.mxu1 %v189_v37  ;;  %v1931_v61 = vand.u32 4294901760, %v1905_v49  ;;  %v1935_v62 = vand.u32 4294901760, %v1916_v54  ;;  %v217_v63 = vand.u32 4294901760, %v216_v51  ;;  %v230_v0 = vsub.f32 %v1894_v43, %v1911_v52 }
  0x33   :  { %1436 = vmatpush3.msra.mxu0 %v1823_v11  ;;  %1463 = vmatpush3.msra.mxu1 %v189_v37  ;;  %v1941_v1 = vand.u32 4294901760, %v1914_v53  ;;  %v1944_v6 = vsub.f32 %v62_v40, %v1903_v47  ;;  %v224_v7 = vand.u32 4294901760, %v223_v56  ;;  %v1947_v8 = vand.u32 4294901760, %v60_v59 }
  0x34   :  { %1437 = vmatprep.subr.mxu0 %v1832_v16  ;;  %1464 = vmatprep.subr.mxu1 %v196_v44  ;;  %v237_v12 = vsub.f32 %v1900_v46, %v1925_v58  ;;  %v1953_v13 = vand.u32 4294901760, %v1928_v60  ;;  %v1957_v25 = vsub.f32 %v1905_v49, %v1931_v61  ;;  %v1960_v30 = vsub.f32 %v61_v48, %v1922_v57 }
  0x35   :  { %1438 = vmatpush3.msra.mxu0 %v1832_v16  ;;  %1465 = vmatpush3.msra.mxu1 %v196_v44  ;;  %v1963_v31 = vand.u32 4294901760, %v59_v2  ;;  %v1967_v32 = vsub.f32 %v1916_v54, %v1935_v62  ;;  %v231_v35 = vand.u32 4294901760, %v230_v0  ;;  %v244_v36 = vsub.f32 %v1914_v53, %v1941_v1 }
  0x36   :  { %1439 = vmatprep.subr.mxu0 %v1854_v24  ;;  %1466 = vmatprep.subr.mxu1 %v203_v50  ;;  %v1973_v37 = vand.u32 4294901760, %v1944_v6  ;;  %v1976_v38 = vand.u32 4294901760, %v58_v18  ;;  %v1979_v40 = vsub.f32 %v60_v59, %v1947_v8  ;;  %v238_v41 = vand.u32 4294901760, %v237_v12 }
  0x37   :  { %1440 = vmatpush3.msra.mxu0 %v1854_v24  ;;  %1467 = vmatpush3.msra.mxu1 %v203_v50  ;;  %v251_v44 = vsub.f32 %v1928_v60, %v1953_v13  ;;  %v2204_v48 = vand.u32 4294901760, %v1957_v25  ;;  %v1986_v50 = vand.u32 4294901760, %v1960_v30  ;;  %v2205_v51 = vand.u32 4294901760, %v1967_v32 }
  0x38   :  { %1441 = vmatprep.subr.mxu0 %v1860_v27  ;;  %1468 = vmatprep.subr.mxu1 %v210_v55  ;;  %v245_v56 = vand.u32 4294901760, %v244_v36  ;;  %v258_v59 = vsub.f32 %v1944_v6, %v1973_v37  ;;  %v2001_v0 = vsub.f32 %v58_v18, %v1976_v38 }
  0x39   :  { %1442 = vmatpush3.msra.mxu0 %v1860_v27  ;;  %1469 = vmatpush3.msra.mxu1 %v210_v55  ;;  %v1991_v55 = vsub.f32 %v59_v2, %v1963_v31  ;;  %v252_v2 = vand.u32 4294901760, %v251_v44  ;;  %v265_v12 = vsub.f32 %v1960_v30, %v1986_v50 }
  0x3a   :  { %1443 = vmatprep.subr.mxu0 %v1879_v34  ;;  %1470 = vmatprep.subr.mxu1 %v217_v63  ;;  %v259_v36 = vand.u32 4294901760, %v258_v59 }
  0x3b   :  { %1444 = vmatpush3.msra.mxu0 %v1879_v34  ;;  %1471 = vmatpush3.msra.mxu1 %v217_v63  ;;  %v1998_v63 = vand.u32 4294901760, %v1979_v40  ;;  %v2014_v18 = vand.u32 4294901760, %v1991_v55 }
  0x3c   :  { %1445 = vmatprep.subr.mxu0 %v1897_v45  ;;  %1472 = vmatprep.subr.mxu1 %v224_v7 }
  0x3d   :  { %1446 = vmatpush3.msra.mxu0 %v1897_v45  ;;  %1473 = vmatpush3.msra.mxu1 %v224_v7  ;;  %v160_v7 = vsub.f32 %v1957_v25, %v2204_v48  ;;  %v272_v44 = vsub.f32 %v1979_v40, %v1998_v63  ;;  %v2021_v48 = vand.u32 4294901760, %v2001_v0  ;;  %v279_v59 = vsub.f32 %v1991_v55, %v2014_v18 }
  0x3e   :  { %1447 = vmatprep.subr.mxu0 %v1903_v47  ;;  %1474 = vmatprep.subr.mxu1 %v231_v35 }
  0x3f   :  { %1448 = vmatpush3.msra.mxu0 %v1903_v47  ;;  %1475 = vmatpush3.msra.mxu1 %v231_v35  ;;  %v170_v35 = vsub.f32 %v1967_v32, %v2205_v51  ;;  %v266_v51 = vand.u32 4294901760, %v265_v12  ;;  %v286_v54 = vsub.f32 %v2001_v0, %v2021_v48 }
  0x40   :  { %1449 = vmatprep.subr.mxu0 %v1922_v57  ;;  %1476 = vmatprep.subr.mxu1 %v238_v41 }
  0x41   :  { %1450 = vmatpush3.msra.mxu0 %v1922_v57  ;;  %1477 = vmatpush3.msra.mxu1 %v238_v41  ;;  %v161_v41 = vand.u32 4294901760, %v160_v7  ;;  %v171_v49 = vand.u32 4294901760, %v170_v35  ;;  %v287_v7 = vand.u32 4294901760, %v286_v54 }
  0x42   :  { %1451 = vmatprep.subr.mxu0 %v1947_v8  ;;  %1478 = vmatprep.subr.mxu1 %v245_v56 }
  0x43   :  { %1452 = vmatpush3.msra.mxu0 %v1947_v8  ;;  %1479 = vmatpush3.msra.mxu1 %v245_v56  ;;  %v273_v56 = vand.u32 4294901760, %v272_v44 }
  0x44   :  { %1453 = vmatprep.subr.mxu0 %v1963_v31  ;;  %1480 = vmatprep.subr.mxu1 %v252_v2 }
  0x45   :  { %1454 = vmatpush3.msra.mxu0 %v1963_v31  ;;  %1481 = vmatpush3.msra.mxu1 %v252_v2  ;;  %v280_v2 = vand.u32 4294901760, %v279_v59 }
  0x46   :  { %1455 = vmatprep.subr.mxu0 %v1976_v38  ;;  %1482 = vmatprep.subr.mxu1 %v259_v36 }
  0x47   :  { %1456 = vmatpush3.msra.mxu0 %v1976_v38  ;;  %1483 = vmatpush3.msra.mxu1 %v259_v36 }
  0x48   :  { %1457 = vmatprep.mubr.f32.mxu0 %v161_v41  ;;  %1484 = vmatprep.subr.mxu1 %v266_v51 }
  0x49   :  { %1495 = vmatprep.subr.mxu0 %v1827_v14  ;;  %1458 = vmatmul.mubr.f32.vlgmr.msra.gmra.mxu0 %v171_v49 }
  0x4a   :  { %1485 = vmatpush3.msra.mxu1 %v266_v51  ;;  %1496 = vmatpush3.msra.mxu0 %v1827_v14  ;;  %v2210_v14 = vand.u32 4294901760, %v1957_v25 }
  0x4b   :  { %1486 = vmatprep.subr.mxu1 %v273_v56  ;;  %1497 = vmatprep.subr.mxu0 %v1830_v15 }
  0x4c   :  { %1487 = vmatpush3.msra.mxu1 %v273_v56  ;;  %1498 = vmatpush3.msra.mxu0 %v1830_v15  ;;  %v2211_v15 = vand.u32 4294901760, %v1967_v32 }
  0x4d   :  { %1488 = vmatprep.subr.mxu1 %v280_v2  ;;  %1499 = vmatprep.subr.mxu0 %v1835_v17 }
  0x4e   :  { %1489 = vmatpush3.msra.mxu1 %v280_v2  ;;  %1500 = vmatpush3.msra.mxu0 %v1835_v17 }
  0x4f   :  { %1490 = vmatprep.subr.mxu1 %v287_v7  ;;  %1501 = vmatprep.subr.mxu0 %v1839_v19 }
  0x50   :  { %1491 = vmatpush3.msra.mxu1 %v287_v7  ;;  %1492 = vmatprep.mubr.f32.mxu1 %v1931_v61 }
  0x51   :  { %1502 = vmatpush3.msra.mxu0 %v1839_v19  ;;  %1493 = vmatmul.mubr.f32.vlgmr.msra.gmra.mxu1 %v1935_v62  ;;  %v57_v19 = vld [vmem:[#allocation2 + $0x8] sm:$0xff] }
  0x52   :  { %1503 = vmatprep.subr.mxu0 %v1842_v20  ;;  %1530 = vmatprep.subr.mxu1 %v1813_v3 }
  0x53   :  { %1504 = vmatpush3.msra.mxu0 %v1842_v20  ;;  %1531 = vmatpush3.msra.mxu1 %v1813_v3 }
  0x54   :  { %1505 = vmatprep.subr.mxu0 %v1866_v29  ;;  %1532 = vmatprep.subr.mxu1 %v1815_v4 }
  0x55   :  { %1506 = vmatpush3.msra.mxu0 %v1866_v29  ;;  %1533 = vmatpush3.msra.mxu1 %v1815_v4 }
  0x56   :  { %1507 = vmatprep.subr.mxu0 %v1876_v33  ;;  %1534 = vmatprep.subr.mxu1 %v1817_v5 }
  0x57   :  { %1508 = vmatpush3.msra.mxu0 %v1876_v33  ;;  %1535 = vmatpush3.msra.mxu1 %v1817_v5 }
  0x58   :  { %1509 = vmatprep.subr.mxu0 %v1894_v43  ;;  %1536 = vmatprep.subr.mxu1 %v1819_v9 }
  0x59   :  { %1510 = vmatpush3.msra.mxu0 %v1894_v43  ;;  %1537 = vmatpush3.msra.mxu1 %v1819_v9 }
  0x5a   :  { %1511 = vmatprep.subr.mxu0 %v1900_v46  ;;  %1538 = vmatprep.subr.mxu1 %v1821_v10 }
  0x5b   :  { %1512 = vmatpush3.msra.mxu0 %v1900_v46  ;;  %1539 = vmatpush3.msra.mxu1 %v1821_v10 }
  0x5c   :  { %1513 = vmatprep.subr.mxu0 %v1914_v53  ;;  %1540 = vmatprep.subr.mxu1 %v1823_v11 }
  0x5d   :  { %1514 = vmatpush3.msra.mxu0 %v1914_v53  ;;  %1541 = vmatpush3.msra.mxu1 %v1823_v11 }
  0x5e   :  { %1515 = vmatprep.subr.mxu0 %v1928_v60  ;;  %1542 = vmatprep.subr.mxu1 %v1832_v16 }
  0x5f   :  { %1516 = vmatpush3.msra.mxu0 %v1928_v60  ;;  %1543 = vmatpush3.msra.mxu1 %v1832_v16 }
  0x60   :  { %1517 = vmatprep.subr.mxu0 %v1944_v6  ;;  %1544 = vmatprep.subr.mxu1 %v1854_v24 }
  0x61   :  { %1518 = vmatpush3.msra.mxu0 %v1944_v6  ;;  %1545 = vmatpush3.msra.mxu1 %v1854_v24 }
  0x62   :  { %1519 = vmatprep.subr.mxu0 %v1960_v30  ;;  %1546 = vmatprep.subr.mxu1 %v1860_v27 }
  0x63   :  { %1520 = vmatpush3.msra.mxu0 %v1960_v30  ;;  %1547 = vmatpush3.msra.mxu1 %v1860_v27 }
  0x64   :  { %1521 = vmatprep.subr.mxu0 %v1979_v40  ;;  %1548 = vmatprep.subr.mxu1 %v1879_v34 }
  0x65   :  { %1522 = vmatpush3.msra.mxu0 %v1979_v40  ;;  %1549 = vmatpush3.msra.mxu1 %v1879_v34 }
  0x66   :  { %1523 = vmatprep.subr.mxu0 %v1991_v55  ;;  %1550 = vmatprep.subr.mxu1 %v1897_v45 }
  0x67   :  { %1524 = vmatpush3.msra.mxu0 %v1991_v55  ;;  %1551 = vmatpush3.msra.mxu1 %v1897_v45 }
  0x68   :  { %1525 = vmatprep.subr.mxu0 %v2001_v0  ;;  %1552 = vmatprep.subr.mxu1 %v1903_v47 }
  0x69   :  { %1526 = vmatpush3.msra.mxu0 %v2001_v0  ;;  %1527 = vmatprep.mubr.f32.mxu0 %v1957_v25 }
  0x6a   :  { %1553 = vmatpush3.msra.mxu1 %v1903_v47  ;;  %1528 = vmatmul.mubr.f32.vlgmr.msra.gmra.mxu0 %v1967_v32 }
  0x6b   :  { %1554 = vmatprep.subr.mxu1 %v1922_v57  ;;  %1565 = vmatprep.subr.mxu0 %v1846_v21 }
  0x6c   :  { %1555 = vmatpush3.msra.mxu1 %v1922_v57  ;;  %1566 = vmatpush3.msra.mxu0 %v1846_v21 }
  0x6d   :  { %1556 = vmatprep.subr.mxu1 %v1947_v8  ;;  %1567 = vmatprep.subr.mxu0 %v1849_v22 }
  0x6e   :  { %1557 = vmatpush3.msra.mxu1 %v1947_v8  ;;  %1568 = vmatpush3.msra.mxu0 %v1849_v22  ;;  %v765_v22 = vsel %vm760_vm0, %v57_v19, 0 }
  0x6f   :  { %1558 = vmatprep.subr.mxu1 %v1963_v31  ;;  %1569 = vmatprep.subr.mxu0 %v1852_v23 }
  0x70   :  { %1559 = vmatpush3.msra.mxu1 %v1963_v31  ;;  %1570 = vmatpush3.msra.mxu0 %v1852_v23 }
  0x71   :  { %1560 = vmatprep.subr.mxu1 %v1976_v38  ;;  %1571 = vmatprep.subr.mxu0 %v1858_v26 }
  0x72   :  { %1561 = vmatpush3.msra.mxu1 %v1976_v38  ;;  %1562 = vmatprep.mubr.f32.mxu1 %v2210_v14  ;;  %v2212_v14 = vld [vmem:[#allocation13_spill] sm:$0xff] }
  0x73   :  { %1572 = vmatpush3.msra.mxu0 %v1858_v26  ;;  %1563 = vmatmul.mubr.f32.vlgmr.msra.gmra.mxu1 %v2211_v15  ;;  %v1270_v15 = vmul.f32 25.0, %v2212_v14 }
  0x74   :  { %1573 = vmatprep.subr.mxu0 %v1863_v28  ;;  %1600 = vmatprep.subr.mxu1 %v1813_v3 }
  0x75   :  { %1574 = vmatpush3.msra.mxu0 %v1863_v28  ;;  %1601 = vmatpush3.msra.mxu1 %v1813_v3  ;;  %v56_v3 = vld [vmem:[#allocation2] sm:$0xff] }
  0x76   :  { %1575 = vmatprep.subr.mxu0 %v1885_v39  ;;  %1602 = vmatprep.subr.mxu1 %v1815_v4 }
  0x77   :  { %1576 = vmatpush3.msra.mxu0 %v1885_v39  ;;  %1603 = vmatpush3.msra.mxu1 %v1815_v4  ;;  %v762_v4 = vsel %vm760_vm0, %v56_v3, 0 }
  0x78   :  { %1577 = vmatprep.subr.mxu0 %v1891_v42  ;;  %1604 = vmatprep.subr.mxu1 %v1817_v5 }
  0x79   :  { %1578 = vmatpush3.msra.mxu0 %v1891_v42  ;;  %1605 = vmatpush3.msra.mxu1 %v1817_v5  ;;  %v2171_v5 = vand.u32 4294901760, %v762_v4 }
  0x7a   :  { %1579 = vmatprep.subr.mxu0 %v1911_v52  ;;  %1606 = vmatprep.subr.mxu1 %v1819_v9 }
  0x7b   :  { %1580 = vmatpush3.msra.mxu0 %v1911_v52  ;;  %1607 = vmatpush3.msra.mxu1 %v1819_v9  ;;  %v2174_v9 = vsub.f32 %v762_v4, %v2171_v5 }
  0x7c   :  { %1581 = vmatprep.subr.mxu0 %v1925_v58  ;;  %1608 = vmatprep.subr.mxu1 %v1821_v10 }
  0x7d   :  { %1582 = vmatpush3.msra.mxu0 %v1925_v58  ;;  %1609 = vmatpush3.msra.mxu1 %v1821_v10  ;;  %v836_v10 = vand.u32 4294901760, %v2174_v9 }
  0x7e   :  { %1583 = vmatprep.subr.mxu0 %v1941_v1  ;;  %1610 = vmatprep.subr.mxu1 %v1823_v11 }
  0x7f   :  { %1584 = vmatpush3.msra.mxu0 %v1941_v1  ;;  %1611 = vmatpush3.msra.mxu1 %v1823_v11  ;;  %v837_v11 = vsub.f32 %v2174_v9, %v836_v10 }
  0x80   :  { %1585 = vmatprep.subr.mxu0 %v1953_v13  ;;  %1612 = vmatprep.subr.mxu1 %v1832_v16 }
  0x81   :  { %1586 = vmatpush3.msra.mxu0 %v1953_v13  ;;  %1613 = vmatpush3.msra.mxu1 %v1832_v16  ;;  %v838_v16 = vand.u32 4294901760, %v837_v11 }
  0x82   :  { %1587 = vmatprep.subr.mxu0 %v1973_v37  ;;  %1614 = vmatprep.subr.mxu1 %v1854_v24 }
  0x83   :  { %1588 = vmatpush3.msra.mxu0 %v1973_v37  ;;  %1615 = vmatpush3.msra.mxu1 %v1854_v24  ;;  %v2181_v24 = vand.u32 4294901760, %v765_v22 }
  0x84   :  { %1589 = vmatprep.subr.mxu0 %v1986_v50  ;;  %1616 = vmatprep.subr.mxu1 %v1860_v27 }
  0x85   :  { %1590 = vmatpush3.msra.mxu0 %v1986_v50  ;;  %1617 = vmatpush3.msra.mxu1 %v1860_v27  ;;  %v845_v33 = vsub.f32 %v765_v22, %v2181_v24 }
  0x86   :  { %1591 = vmatprep.subr.mxu0 %v1998_v63  ;;  %1618 = vmatprep.subr.mxu1 %v1879_v34 }
  0x87   :  { %1592 = vmatpush3.msra.mxu0 %v1998_v63  ;;  %1619 = vmatpush3.msra.mxu1 %v1879_v34 }
  0x88   :  { %1593 = vmatprep.subr.mxu0 %v2014_v18  ;;  %1620 = vmatprep.subr.mxu1 %v1897_v45 }
  0x89   :  { %1594 = vmatpush3.msra.mxu0 %v2014_v18  ;;  %1621 = vmatpush3.msra.mxu1 %v1897_v45 }
  0x8a   :  { %1595 = vmatprep.subr.mxu0 %v2021_v48  ;;  %1622 = vmatprep.subr.mxu1 %v1903_v47 }
  0x8b   :  { %1596 = vmatpush3.msra.mxu0 %v2021_v48  ;;  %1597 = vmatprep.mubr.f32.mxu0 %v1931_v61 }
  0x8c   :  { %1623 = vmatpush3.msra.mxu1 %v1903_v47  ;;  %1598 = vmatmul.mubr.f32.vlgmr.msra.gmra.mxu0 %v1935_v62  ;;  %v846_v47 = vand.u32 4294901760, %v845_v33 }
  0x8d   :  { %1624 = vmatprep.subr.mxu1 %v1922_v57  ;;  %1632 = vmatprep.mubr.f32.mxu1 %v1931_v61 }
  0x8e   :  { %1625 = vmatpush3.msra.mxu1 %v1922_v57  ;;  %1639 = vmatprep.mubr.f32.mxu0 %v838_v16  ;;  %v847_v60 = vsub.f32 %v845_v33, %v846_v47 }
  0x8f   :  { %1626 = vmatprep.subr.mxu1 %v1947_v8 }
  0x90   :  { %1627 = vmatpush3.msra.mxu1 %v1947_v8  ;;  %v848_v13 = vand.u32 4294901760, %v847_v60 }
  0x91   :  { %1628 = vmatprep.subr.mxu1 %v1963_v31 }
  0x92   :  { %1629 = vmatpush3.msra.mxu1 %v1963_v31 }
  0x93   :  { %1630 = vmatprep.subr.mxu1 %v1976_v38 }
  0x94   :  { %1631 = vmatpush3.msra.mxu1 %v1976_v38 }
  0x95   :  { %1633 = vmatmul.mubr.f32.vlgmr.msra.gmra.mxu1 %v1935_v62 }
  0x96   :  { %1646 = vmatprep.mubr.f32.mxu1 %v2171_v5 }
 0x109   :  { %v1459_v17 = vpop.f32.mrf.mxu0 }
 0x10b   :  { %v163_v20 = vpop.f32.mrf.mxu0 }
 0x111   :  { %v1494_v21 = vpop.f32.mrf.mxu1 }
 0x112   :  { %v331_v29 = vadd.f32 %v1494_v21, %v1459_v17 }
 0x113   :  { %v324_v26 = vpop.f32.mrf.mxu1 }
 0x114   :  { %v325_v39 = vadd.f32 %v324_v26, %v163_v20 }
 0x12a   :  { %v1529_v23 = vpop.f32.mrf.mxu0 }
 0x12b   :  { %v442_v42 = vadd.f32 %v1529_v23, %v331_v29 }
 0x12c   :  { %v434_v27 = vpop.f32.mrf.mxu0 }
 0x12d   :  { %v435_v45 = vadd.f32 %v434_v27, %v325_v39 }
 0x133   :  { %v1564_v28 = vpop.f32.mrf.mxu1 }
 0x134   :  { %v539_v46 = vadd.f32 %v1564_v28, %v442_v42 }
 0x135   :  { %v530_v43 = vpop.f32.mrf.mxu1 }
 0x136   :  { %v531_v52 = vadd.f32 %v530_v43, %v435_v45 }
 0x14c   :  { %v1599_v34 = vpop.f32.mrf.mxu0 }
 0x14d   :  { %v664_v53 = vadd.f32 %v1599_v34, %v539_v46 }
 0x14e   :  { %v657_v49 = vpop.f32.mrf.mxu0 }
 0x14f   :  { %v658_v57 = vadd.f32 %v657_v49, %v531_v52 }
 0x155   :  { %v1634_v54 = vpop.f32.mrf.mxu1 }
 0x156   :  { %v757_v58 = vadd.f32 %v1634_v54, %v664_v53 }
 0x157   :  { %v750_v61 = vpop.f32.mrf.mxu1 }
 0x158   :  { %v796_v62 = vand.u32 4294901760, %v757_v58  ;;  %v751_v1 = vadd.f32 %v750_v61, %v658_v57 }
 0x15a   :  { %v884_v6 = vsub.f32 %v757_v58, %v796_v62  ;;  %v799_v8 = vand.u32 4294901760, %v751_v1  ;;  %1635 = vmatprep.subr.mxu0 %v796_v62 }
 0x15b   :  { %1636 = vmatpush3.msra.mxu0 %v796_v62 }
 0x15c   :  { %v891_v25 = vsub.f32 %v751_v1, %v799_v8  ;;  %1637 = vmatprep.subr.mxu0 %v799_v8  ;;  %v885_v30 = vand.u32 4294901760, %v884_v6 }
 0x15d   :  { %1638 = vmatpush3.msra.mxu0 %v799_v8 }
 0x15e   :  { %1649 = vmatprep.subr.mxu0 %v884_v6  ;;  %1640 = vmatmul.mubr.f32.vlgmr.msra.gmra.mxu0 %v848_v13  ;;  %v886_v31 = vsub.f32 %v884_v6, %v885_v30  ;;  %v892_v32 = vand.u32 4294901760, %v891_v25 }
 0x15f   :  { %1650 = vmatpush3.msra.mxu0 %v884_v6  ;;  %1653 = vmatprep.mubr.f32.mxu0 %v2174_v9 }
 0x160   :  { %1651 = vmatprep.subr.mxu0 %v891_v25  ;;  %v887_v37 = vand.u32 4294901760, %v886_v31  ;;  %v893_v38 = vsub.f32 %v891_v25, %v892_v32 }
 0x161   :  { %1652 = vmatpush3.msra.mxu0 %v891_v25 }
 0x162   :  { %1642 = vmatprep.subr.mxu1 %v887_v37  ;;  %1663 = vmatprep.subr.mxu0 %v885_v30  ;;  %v894_v40 = vand.u32 4294901760, %v893_v38 }
 0x163   :  { %1643 = vmatpush3.msra.mxu1 %v887_v37  ;;  %1654 = vmatmul.mubr.f32.vlgmr.msra.gmra.mxu0 %v845_v33 }
 0x164   :  { %1664 = vmatpush3.msra.mxu0 %v885_v30  ;;  %1644 = vmatprep.subr.mxu1 %v894_v40 }
 0x165   :  { %1665 = vmatprep.subr.mxu0 %v892_v32  ;;  %1645 = vmatpush3.msra.mxu1 %v894_v40 }
 0x166   :  { %1666 = vmatpush3.msra.mxu0 %v892_v32  ;;  %1647 = vmatmul.mubr.f32.vlgmr.msra.gmra.mxu1 %v2181_v24 }
 0x167   :  { %1656 = vmatprep.subr.mxu1 %v796_v62  ;;  %1660 = vmatprep.mubr.f32.mxu1 %v836_v10  ;;  %v2213_v10 = vld [vmem:[#allocation12_spill] sm:$0xff] }
 0x168   :  { %1657 = vmatpush3.msra.mxu1 %v796_v62  ;;  %1667 = vmatprep.mubr.f32.mxu0 %v2171_v5  ;;  %v1269_v11 = vmul.f32 25.0, %v2213_v10 }
 0x169   :  { %1658 = vmatprep.subr.mxu1 %v799_v8  ;;  %1668 = vmatmul.mubr.f32.vlgmr.msra.gmra.mxu0 %v2181_v24 }
 0x16a   :  { %1659 = vmatpush3.msra.mxu1 %v799_v8 }
 0x16b   :  { %1661 = vmatmul.mubr.f32.vlgmr.msra.gmra.mxu1 %v846_v47  ;;  %1670 = vmatprep.subr.mxu1 %v796_v62 }
 0x16c   :  { %1671 = vmatpush3.msra.mxu1 %v796_v62  ;;  %1674 = vmatprep.mubr.f32.mxu1 %v2171_v5 }
 0x16d   :  { %1672 = vmatprep.subr.mxu1 %v799_v8 }
 0x16e   :  { %1673 = vmatpush3.msra.mxu1 %v799_v8 }
 0x16f   :  { %1675 = vmatmul.mubr.f32.vlgmr.msra.gmra.mxu1 %v2181_v24 }
 0x21e   :  { %v1641_v48 = vpop.f32.mrf.mxu0 }
 0x220   :  { %v840_v50 = vpop.f32.mrf.mxu0 }
 0x223   :  { %v1655_v51 = vpop.f32.mrf.mxu0 }
 0x225   :  { %v1013_v0 = vpop.f32.mrf.mxu0 }
 0x226   :  { %v1648_v55 = vpop.f32.mrf.mxu1 }
 0x227   :  { %v938_v63 = vadd.f32 %v1648_v55, %v1641_v48 }
 0x228   :  { %v931_v12 = vpop.f32.mrf.mxu1 }
 0x229   :  { %v1021_v35 = vadd.f32 %v1655_v51, %v938_v63  ;;  %v932_v18 = vadd.f32 %v931_v12, %v840_v50  ;;  %v1669_v41 = vpop.f32.mrf.mxu0 }
 0x22b   :  { %v1014_v36 = vadd.f32 %v1013_v0, %v932_v18  ;;  %v1662_v44 = vpop.f32.mrf.mxu1  ;;  %v1180_v3 = vpop.f32.mrf.mxu0 }
 0x22c   :  { %v1104_v59 = vadd.f32 %v1662_v44, %v1021_v35 }
 0x22d   :  { %v1095_v56 = vpop.f32.mrf.mxu1 }
 0x22e   :  { %v1187_v2 = vadd.f32 %v1669_v41, %v1104_v59  ;;  %v1096_v7 = vadd.f32 %v1095_v56, %v1014_v36 }
 0x22f   :  { %v1676_v4 = vpop.f32.mrf.mxu1 }
 0x230   :  { %v1181_v5 = vadd.f32 %v1180_v3, %v1096_v7  ;;  %v1266_v9 = vadd.f32 %v1676_v4, %v1187_v2 }
 0x231   :  { %v1259_v16 = vpop.f32.mrf.mxu1 }
 0x232   :  { %v1272_v17 = vsub.f32 %v1266_v9, %v1270_v15  ;;  %v1260_v19 = vadd.f32 %v1259_v16, %v1181_v5 }
 0x234   :  { %1274 = vst [vmem:[#allocation8 + $0x8] sm:$0xff] %v1272_v17  ;;  %v1271_v20 = vsub.f32 %v1260_v19, %v1269_v11 }
 0x236   :  { %1273 = vst [vmem:[#allocation8] sm:$0xff] %v1271_v20 }
 0x237   :  { %1754 = shalt.err (!%p1751_p5)
}
 0x238   :  { %1286 = dma.vmem_to_hbm [thread:$0]  %s1281_s2, 256, %s2203_s3, [#allocation4], %s1771_s17, %s1771_s17, %s1772_s18  }
 0x239   :  { %1767 = dma.done.wait [#allocation4], 256  }
 0x23a   :  { %1768 = vsyncadd [#allocation4], 4294967040 }
 0x23b   :  { %1290 = vsyncpa [#allocation3], 1 }
 0x23c   :  { %1291 = vsyncpa [#allocation6], 1 }
 0x23d   :  { %1292 = vsyncpa [#allocation4], 1 }

</bundles_post_ra>
